<compile_context>
chip_gen: v6e
topology: v6e:2x2x1
jax: 0.10.0
libtpu: 0.0.40
codegen_flags: <defaults>
</compile_context>

<pallas_src>
import functools

import jax
import jax.numpy as jnp
from jax.experimental import pallas as pl
from jax.experimental.pallas import tpu as pltpu

LN_EPS = 1e-5


def ntk_kernel(x_ref, w1_ref, b1_ref, w2_ref, b2_ref, o_ref, *, inv_h1):
    # x_ref:  (TB, D_in)          bf16
    # w1_ref: (D_in, H1_pad)      bf16   (VMEM-resident across grid steps)
    # b1_ref: (1, H1_pad)         f32
    # w2_ref: (H1_pad, D_out_pad) bf16   (lane-padded; padded rows are zero)
    # b2_ref: (1, D_out_pad)      f32
    # o_ref:  (TB, D_out_pad)     f32
    h = jnp.dot(x_ref[...], w1_ref[...], preferred_element_type=jnp.float32)
    h = jnp.maximum(h + b1_ref[...], 0.0)  # bias + ReLU in f32 on the VPU
    # Padded hidden columns are exactly zero here, so full-width sums equal
    # sums over the real H1 columns; divide by the real H1 count.
    mean = jnp.sum(h, axis=-1, keepdims=True) * inv_h1
    mean_sq = jnp.sum(h * h, axis=-1, keepdims=True) * inv_h1
    var = mean_sq - mean * mean
    hn = (h - mean) * jax.lax.rsqrt(var + LN_EPS)
    # Padded columns of hn are nonzero (-mean * rsqrt), but the corresponding
    # rows of w2 are zero, so they contribute nothing to the output.
    o_ref[...] = (
        jnp.dot(hn.astype(jnp.bfloat16), w2_ref[...],
                preferred_element_type=jnp.float32)
        + b2_ref[...]
    )


def _round_up(n, m):
    return ((n + m - 1) // m) * m


def make_ntk_forward(w1, b1, w2, b2, *, max_tile_b=512):
    """Prepare weights once (PyTorch convention: w1 (H1, D_in), w2 (D_out, H1))
    and return a jitted forward(x_nchw) -> (B, D_out) f32."""
    h1, d_in = w1.shape
    d_out = w2.shape[0]
    h1_pad = _round_up(h1, 128)      # lane-dense hidden activations
    d_out_pad = _round_up(d_out, 128)  # lane-dense (unmasked) output store

    # One-time prep (hoisted out of the per-call path).
    w1_t = (jnp.zeros((d_in, h1_pad), jnp.bfloat16)
            .at[:, :h1].set(w1.T.astype(jnp.bfloat16)))              # (D_in, Hp)
    b1_r = (jnp.zeros((1, h1_pad), jnp.float32)
            .at[0, :h1].set(b1.astype(jnp.float32)))                 # (1, Hp)
    w2_t = (jnp.zeros((h1_pad, d_out_pad), jnp.bfloat16)
            .at[:h1, :d_out].set(w2.T.astype(jnp.bfloat16)))         # (Hp, Dp)
    b2_r = (jnp.zeros((1, d_out_pad), jnp.float32)
            .at[0, :d_out].set(b2.astype(jnp.float32)))              # (1, Dp)

    kernel = functools.partial(ntk_kernel, inv_h1=1.0 / float(h1))

    @jax.jit
    def forward(x_nchw):
        B = x_nchw.shape[0]
        # torch.flatten(x, 1); bf16 only for the MXU operand.
        x_flat = x_nchw.reshape(B, -1).astype(jnp.bfloat16)

        # Tile batch: tile size multiple of 8 (sublanes), capped for VMEM
        # (sized to fit comfortably inside v7x's 32 MiB scoped VMEM too).
        tile_b = min(max_tile_b, _round_up(B, 8))
        b_pad = _round_up(B, tile_b)
        if b_pad != B:
            x_flat = jnp.pad(x_flat, ((0, b_pad - B), (0, 0)))
        grid = (b_pad // tile_b,)

        out = pl.pallas_call(
            kernel,
            out_shape=jax.ShapeDtypeStruct((b_pad, d_out_pad), jnp.float32),
            grid=grid,
            in_specs=[
                pl.BlockSpec((tile_b, d_in), lambda i: (i, 0)),
                pl.BlockSpec((d_in, h1_pad), lambda i: (0, 0)),       # resident
                pl.BlockSpec((1, h1_pad), lambda i: (0, 0)),          # resident
                pl.BlockSpec((h1_pad, d_out_pad), lambda i: (0, 0)),  # resident
                pl.BlockSpec((1, d_out_pad), lambda i: (0, 0)),       # resident
            ],
            out_specs=pl.BlockSpec((tile_b, d_out_pad), lambda i: (i, 0)),
            compiler_params=pltpu.CompilerParams(
                dimension_semantics=("parallel",),  # shards across v7x's 2 TCs
                vmem_limit_bytes=32 << 20,
            ),
        )(x_flat, w1_t, b1_r, w2_t, b2_r)
        return out[:B, :d_out]

    return forward


def init_params(key, input_size, hidden_size_1, output_size):
    """Deterministic init mimicking torch.nn.Linear default U[-1/sqrt(fan_in), ...]."""
    k1, k2, k3, k4 = jax.random.split(key, 4)
    lim1 = 1.0 / jnp.sqrt(input_size)
    lim2 = 1.0 / jnp.sqrt(hidden_size_1)
    w1 = jax.random.uniform(k1, (hidden_size_1, input_size), jnp.float32, -lim1, lim1)
    b1 = jax.random.uniform(k2, (hidden_size_1,), jnp.float32, -lim1, lim1)
    w2 = jax.random.uniform(k3, (output_size, hidden_size_1), jnp.float32, -lim2, lim2)
    b2 = jax.random.uniform(k4, (output_size,), jnp.float32, -lim2, lim2)
    return w1, b1, w2, b2


def _reference(x_nchw, w1, b1, w2, b2, *, bf16_matmuls):
    """Plain-JAX reference; bf16_matmuls=True mirrors the kernel's casts."""
    B = x_nchw.shape[0]
    x_flat = x_nchw.reshape(B, -1)
    if bf16_matmuls:
        h = jnp.dot(x_flat.astype(jnp.bfloat16), w1.T.astype(jnp.bfloat16),
                    preferred_element_type=jnp.float32) + b1
    else:
        h = x_flat @ w1.T + b1
    h = jnp.maximum(h, 0.0)
    mean = jnp.mean(h, axis=-1, keepdims=True)
    var = jnp.mean((h - mean) ** 2, axis=-1, keepdims=True)
    hn = (h - mean) * jax.lax.rsqrt(var + LN_EPS)
    if bf16_matmuls:
        return jnp.dot(hn.astype(jnp.bfloat16), w2.T.astype(jnp.bfloat16),
                       preferred_element_type=jnp.float32) + b2
    return hn @ w2.T + b2


if __name__ == "__main__":
    key = jax.random.PRNGKey(0)
    kx, kp = jax.random.split(key)

    # Small image-like input: (B, C, H, W) = (2, 4, 16, 16) -> input_size = 1024
    B, C, H, W = 2, 4, 16, 16
    input_size = C * H * W
    hidden_size_1 = 32
    output_size = 8

    x = jax.random.normal(kx, (B, C, H, W), dtype=jnp.float32)
    w1, b1, w2, b2 = init_params(kp, input_size, hidden_size_1, output_size)

    forward = make_ntk_forward(w1, b1, w2, b2)
    out = forward(x)
    jax.block_until_ready(out)
    assert out.shape == (B, output_size)

    # Tight check vs a bf16-matmul-matched JAX reference (same math as kernel).
    ref_matched = _reference(x, w1, b1, w2, b2, bf16_matmuls=True)
    assert jnp.allclose(out, ref_matched, atol=2e-3, rtol=2e-3), \
        "mismatch vs bf16-matched reference"

    # Semantic check vs the full-f32 PyTorch-equivalent math (loose: bf16 MXU inputs).
    ref_f32 = _reference(x, w1, b1, w2, b2, bf16_matmuls=False)
    assert jnp.allclose(out, ref_f32, atol=5e-2, rtol=5e-2), \
        "mismatch vs f32 reference"

    print("KERNEL_OK")
</pallas_src>

<mosaic_0001>
module attributes {stable_mosaic.version = 11 : i64} {
  func.func @ntk_kernel(%arg0: i32, %arg1: memref<8x1024xbf16, #tpu.memory_space<vmem>>, %arg2: memref<1024x128xbf16, #tpu.memory_space<vmem>>, %arg3: memref<1x128xf32, #tpu.memory_space<vmem>>, %arg4: memref<128x128xbf16, #tpu.memory_space<vmem>>, %arg5: memref<1x128xf32, #tpu.memory_space<vmem>>, %arg6: memref<8x128xf32, #tpu.memory_space<vmem>>) attributes {dimension_semantics = [#tpu.dimension_semantics<parallel>], iteration_bounds = array<i64: 1>, scalar_prefetch = 0 : i64, scratch_operands = 0 : i64, tpu.core_type = #tpu.core_type<tc>, window_params = [{transform_indices = @transform_0, window_bounds = array<i64: 8, 1024>}, {pipeline_mode = #tpu.pipeline_mode<synchronous>, transform_indices = @transform_1, window_bounds = array<i64: 1024, 128>}, {pipeline_mode = #tpu.pipeline_mode<synchronous>, transform_indices = @transform_2, window_bounds = array<i64: 1, 128>}, {pipeline_mode = #tpu.pipeline_mode<synchronous>, transform_indices = @transform_3, window_bounds = array<i64: 128, 128>}, {pipeline_mode = #tpu.pipeline_mode<synchronous>, transform_indices = @transform_4, window_bounds = array<i64: 1, 128>}, {transform_indices = @transform_5, window_bounds = array<i64: 8, 128>}]} {
    %c0 = arith.constant 0 : index
    %c0_0 = arith.constant 0 : index
    %0 = vector.load %arg1[%c0, %c0_0] : memref<8x1024xbf16, #tpu.memory_space<vmem>>, vector<8x1024xbf16>
    %c0_1 = arith.constant 0 : index
    %c0_2 = arith.constant 0 : index
    %1 = vector.load %arg2[%c0_1, %c0_2] : memref<1024x128xbf16, #tpu.memory_space<vmem>>, vector<1024x128xbf16>
    %cst = arith.constant dense<0.000000e+00> : vector<8x128xf32>
    %2 = tpu.matmul %0, %1, %cst {dimension_numbers = #tpu.dot_dimension_numbers<[1], [0], [0], [1], [0, 0, 1, 1], [], []>} : vector<8x1024xbf16>, vector<1024x128xbf16>, vector<8x128xf32> -> vector<8x128xf32>
    %c0_3 = arith.constant 0 : index
    %c0_4 = arith.constant 0 : index
    %3 = vector.load %arg3[%c0_3, %c0_4] : memref<1x128xf32, #tpu.memory_space<vmem>>, vector<1x128xf32>
    %4 = vector.broadcast %3 : vector<1x128xf32> to vector<8x128xf32>
    %5 = arith.addf %2, %4 : vector<8x128xf32>
    %cst_5 = arith.constant 0.000000e+00 : f32
    %6 = vector.broadcast %cst_5 : f32 to vector<8x128xf32>
    %7 = arith.maximumf %5, %6 : vector<8x128xf32>
    %cst_6 = arith.constant dense<0.000000e+00> : vector<8xf32>
    %8 = vector.multi_reduction <add>, %7, %cst_6 [1] : vector<8x128xf32> to vector<8xf32>
    %9 = vector.shape_cast %8 : vector<8xf32> to vector<8x1xf32>
    %cst_7 = arith.constant 3.125000e-02 : f32
    %10 = vector.broadcast %cst_7 : f32 to vector<8x1xf32>
    %11 = arith.mulf %9, %10 : vector<8x1xf32>
    %12 = arith.mulf %7, %7 : vector<8x128xf32>
    %cst_8 = arith.constant dense<0.000000e+00> : vector<8xf32>
    %13 = vector.multi_reduction <add>, %12, %cst_8 [1] : vector<8x128xf32> to vector<8xf32>
    %14 = vector.shape_cast %13 : vector<8xf32> to vector<8x1xf32>
    %cst_9 = arith.constant 3.125000e-02 : f32
    %15 = vector.broadcast %cst_9 : f32 to vector<8x1xf32>
    %16 = arith.mulf %14, %15 : vector<8x1xf32>
    %17 = arith.mulf %11, %11 : vector<8x1xf32>
    %18 = arith.subf %16, %17 : vector<8x1xf32>
    %19 = vector.broadcast %11 : vector<8x1xf32> to vector<8x128xf32>
    %20 = arith.subf %7, %19 : vector<8x128xf32>
    %cst_10 = arith.constant 9.99999974E-6 : f32
    %21 = vector.broadcast %cst_10 : f32 to vector<8x1xf32>
    %22 = arith.addf %18, %21 : vector<8x1xf32>
    %23 = math.rsqrt %22 : vector<8x1xf32>
    %24 = vector.broadcast %23 : vector<8x1xf32> to vector<8x128xf32>
    %25 = arith.mulf %20, %24 : vector<8x128xf32>
    %26 = arith.truncf %25 : vector<8x128xf32> to vector<8x128xbf16>
    %c0_11 = arith.constant 0 : index
    %c0_12 = arith.constant 0 : index
    %27 = vector.load %arg4[%c0_11, %c0_12] : memref<128x128xbf16, #tpu.memory_space<vmem>>, vector<128x128xbf16>
    %cst_13 = arith.constant dense<0.000000e+00> : vector<8x128xf32>
    %28 = tpu.matmul %26, %27, %cst_13 {dimension_numbers = #tpu.dot_dimension_numbers<[1], [0], [0], [1], [0, 0, 1, 1], [], []>} : vector<8x128xbf16>, vector<128x128xbf16>, vector<8x128xf32> -> vector<8x128xf32>
    %c0_14 = arith.constant 0 : index
    %c0_15 = arith.constant 0 : index
    %29 = vector.load %arg5[%c0_14, %c0_15] : memref<1x128xf32, #tpu.memory_space<vmem>>, vector<1x128xf32>
    %30 = vector.broadcast %29 : vector<1x128xf32> to vector<8x128xf32>
    %31 = arith.addf %28, %30 : vector<8x128xf32>
    %c0_16 = arith.constant 0 : index
    %c0_17 = arith.constant 0 : index
    %32 = vector.load %arg6[%c0_16, %c0_17] : memref<8x128xf32, #tpu.memory_space<vmem>>, vector<8x128xf32>
    tpu.vector_store %arg6[%c0_16, %c0_17], %31 {strides = array<i32>} : memref<8x128xf32, #tpu.memory_space<vmem>>, vector<8x128xf32>,
    return
  }
  func.func @transform_0(%arg0: i32) -> (i32, i32) {
    %c0_i32 = arith.constant 0 : i32
    %c0_i32_0 = arith.constant 0 : i32
    return %arg0, %c0_i32 : i32, i32
  }
  func.func @transform_1(%arg0: i32) -> (i32, i32) {
    %c0_i32 = arith.constant 0 : i32
    %c0_i32_0 = arith.constant 0 : i32
    %c0_i32_1 = arith.constant 0 : i32
    return %c0_i32, %c0_i32_0 : i32, i32
  }
  func.func @transform_2(%arg0: i32) -> (i32, i32) {
    %c0_i32 = arith.constant 0 : i32
    %c0_i32_0 = arith.constant 0 : i32
    %c0_i32_1 = arith.constant 0 : i32
    return %c0_i32, %c0_i32_0 : i32, i32
  }
  func.func @transform_3(%arg0: i32) -> (i32, i32) {
    %c0_i32 = arith.constant 0 : i32
    %c0_i32_0 = arith.constant 0 : i32
    %c0_i32_1 = arith.constant 0 : i32
    return %c0_i32, %c0_i32_0 : i32, i32
  }
  func.func @transform_4(%arg0: i32) -> (i32, i32) {
    %c0_i32 = arith.constant 0 : i32
    %c0_i32_0 = arith.constant 0 : i32
    %c0_i32_1 = arith.constant 0 : i32
    return %c0_i32, %c0_i32_0 : i32, i32
  }
  func.func @transform_5(%arg0: i32) -> (i32, i32) {
    %c0_i32 = arith.constant 0 : i32
    %c0_i32_0 = arith.constant 0 : i32
    return %arg0, %c0_i32 : i32, i32
  }
}

</mosaic_0001>

<bundles_post_ra>
// kernel: forward.1
= control target key start
LH: loop header
LB: loop body
LE: loop exit
PB: predicated region body
PF: predicated region fallthrough
CT: control target
= control target key end

     0   :  { %10 = vsyncpa [#allocation3], 0  ;;  %s1186_s18 = smov [#allocation2]   ;;  %s1269_s0 = inlined_call_operand.vmem [shape: bf16[8,1024], index: 0, kind: input, shape index: {}]   ;;  %s1270_s1 = inlined_call_operand.hbm [shape: bf16[1024,128], index: 1, kind: input, shape index: {}]   ;;  %s1271_s2 = inlined_call_operand.vmem [shape: f32[1,128], index: 2, kind: input, shape index: {}]   ;;  %s1272_s3 = inlined_call_operand.vmem [shape: bf16[128,128], index: 3, kind: input, shape index: {}]   ;;  %s1273_s4 = inlined_call_operand.vmem [shape: f32[1,128], index: 4, kind: input, shape index: {}]   ;;  %s1274_s5 = inlined_call_operand.vmem [shape: f32[8,128], index: 5, kind: output, shape index: {}]  }
   0x1   :  { %s18_s19 = sshll.u32 %s1186_s18, 4  ;;  %s19_s19 = int_to_ptr.vmem [resolvable:$true] %s18_s19 }
   0x2   :  { %s1172_s20 = scalar_lea.vmem %s19_s19, 8192  ;;  %p1177_p1 = scmp.lt.s32.totalorder %s19_s19, %s19_s19 }
   0x3   :  { %p1173_p0 = scmp.ne.s32.totalorder %s19_s19, %s1172_s20  ;;  %p1178_p2 = scmp.lt.s32.totalorder %s1172_s20, %s1172_s20 }
   0x5   :  { %p1179_p3 = por %p1178_p2, %p1177_p1 }
   0x7   :  { %p1180_p4 = pnand %p1179_p3, %p1173_p0 }
   0x9   :  { %1183 = shalt.err (!%p1180_p4)
}
   0xa   :  { %s1187_s21 = smov 64   ;;  %s1188_s22 = smov 4  }
   0xb   :  { %24 = dma.hbm_to_vmem [thread:$0]  %s1270_s1, 8192, %s19_s19, [#allocation3], %s1187_s21, %s1187_s21, %s1188_s22  }
   0xc   :  { %1184 = dma.done.wait [#allocation3], 8192  }
   0xd   :  { %1185 = vsyncadd [#allocation3], 4294959104  ;;  %v1082_v0 = vld [vmem:[#allocation2 + $0x78] sm:$0xff]   ;;  %v1086_v4 = vld [vmem:[#allocation2 + $0x70] sm:$0xff]   ;;  %vm1190_vm0 = vmmov 0  }
   0xe   :  { %v1083_v1 = vld [vmem:[#allocation2 + $0xf8] sm:$0xff]   ;;  %960 = vmatprep.subr.bf16.mxu0 %v1082_v0  ;;  %v1087_v5 = vld [vmem:[#allocation2 + $0xf0] sm:$0xff]   ;;  %v1090_v8 = vld [vmem:[#allocation2 + $0x68] sm:$0xff]  }
   0xf   :  { %v1084_v2 = vld [vmem:[#allocation2 + $0x38] sm:$0xff]   ;;  %982 = vmatprep.subr.bf16.mxu1 %v1083_v1  ;;  %v1088_v6 = vld [vmem:[#allocation2 + $0x30] sm:$0xff]   ;;  %v1091_v9 = vld [vmem:[#allocation2 + $0xe8] sm:$0xff]  }
  0x10   :  { %v1085_v3 = vld [vmem:[#allocation2 + $0xb8] sm:$0xff]   ;;  %961 = vmatpush3.bf16.msra.mxu0 %v1084_v2  ;;  %v1089_v7 = vld [vmem:[#allocation2 + $0xb0] sm:$0xff]   ;;  %v1092_v10 = vld [vmem:[#allocation2 + $0x28] sm:$0xff]  }
  0x11   :  { %983 = vmatpush3.bf16.msra.mxu1 %v1085_v3  ;;  %962 = vmatprep.subr.bf16.mxu0 %v1086_v4  ;;  %v1093_v11 = vld [vmem:[#allocation2 + $0xa8] sm:$0xff]   ;;  %v1094_v12 = vld [vmem:[#allocation2 + $0x60] sm:$0xff]   ;;  %v1098_v16 = vld [vmem:[#allocation2 + $0x58] sm:$0xff]  }
  0x12   :  { %984 = vmatprep.subr.bf16.mxu1 %v1087_v5  ;;  %v1095_v13 = vld [vmem:[#allocation2 + $0xe0] sm:$0xff]   ;;  %v1099_v17 = vld [vmem:[#allocation2 + $0xd8] sm:$0xff]   ;;  %v1102_v20 = vld [vmem:[#allocation2 + $0x50] sm:$0xff]  }
  0x13   :  { %v1096_v14 = vld [vmem:[#allocation2 + $0x20] sm:$0xff]   ;;  %v1100_v18 = vld [vmem:[#allocation2 + $0x18] sm:$0xff]   ;;  %v1103_v21 = vld [vmem:[#allocation2 + $0xd0] sm:$0xff]  }
  0x14   :  { %963 = vmatpush3.bf16.msra.mxu0 %v1088_v6  ;;  %v1097_v15 = vld [vmem:[#allocation2 + $0xa0] sm:$0xff]   ;;  %v1101_v19 = vld [vmem:[#allocation2 + $0x98] sm:$0xff]   ;;  %v1104_v22 = vld [vmem:[#allocation2 + $0x10] sm:$0xff]  }
  0x15   :  { %985 = vmatpush3.bf16.msra.mxu1 %v1089_v7  ;;  %964 = vmatprep.subr.bf16.mxu0 %v1090_v8  ;;  %v1105_v23 = vld [vmem:[#allocation2 + $0x90] sm:$0xff]   ;;  %v1106_v24 = vld [vmem:[#allocation2 + $0x48] sm:$0xff]   ;;  %v1110_v28 = vld [vmem:[#allocation2 + $0x40] sm:$0xff]  }
  0x16   :  { %986 = vmatprep.subr.bf16.mxu1 %v1091_v9  ;;  %v1107_v25 = vld [vmem:[#allocation2 + $0xc8] sm:$0xff]   ;;  %v1111_v29 = vld [vmem:[#allocation2 + $0xc0] sm:$0xff]   ;;  %v1118_v38 = vld [vmem:[#allocation2 + $0x178] sm:$0xff]  }
  0x17   :  { %v1108_v26 = vld [vmem:[#allocation2 + $0x8] sm:$0xff]   ;;  %v1112_v30 = vld [vmem:[#allocation2] sm:$0xff]   ;;  %v1119_v39 = vld [vmem:[#allocation2 + $0x1f8] sm:$0xff]  }
  0x18   :  { %965 = vmatpush3.bf16.msra.mxu0 %v1092_v10  ;;  %v1109_v27 = vld [vmem:[#allocation2 + $0x88] sm:$0xff]   ;;  %v1113_v31 = vld [vmem:[#allocation2 + $0x80] sm:$0xff]   ;;  %v1120_v40 = vld [vmem:[#allocation2 + $0x138] sm:$0xff]  }
  0x19   :  { %987 = vmatpush3.bf16.msra.mxu1 %v1093_v11  ;;  %966 = vmatprep.subr.bf16.mxu0 %v1094_v12  ;;  %v35_v32 = vld [vmem:[%s1269_s0] sm:$0xff]  ;;  %v36_v33 = vld [vmem:[%s1269_s0 + $0x8] sm:$0xff]  ;;  %v1121_v41 = vld [vmem:[#allocation2 + $0x1b8] sm:$0xff]  }
  0x1a   :  { %988 = vmatprep.subr.bf16.mxu1 %v1095_v13  ;;  %v879_v34 = vcombine.low %v35_v32, %v35_v32  ;;  %v880_v35 = vcombine.high %v35_v32, %v35_v32  ;;  %v881_v36 = vcombine.low %v36_v33, %v36_v33  ;;  %v882_v37 = vcombine.high %v36_v33, %v36_v33  ;;  %v1122_v42 = vld [vmem:[#allocation2 + $0x170] sm:$0xff]   ;;  %v1126_v46 = vld [vmem:[#allocation2 + $0x168] sm:$0xff]   ;;  %v1130_v50 = vld [vmem:[#allocation2 + $0x160] sm:$0xff]  }
  0x1b   :  { %v1123_v43 = vld [vmem:[#allocation2 + $0x1f0] sm:$0xff]   ;;  %v1127_v47 = vld [vmem:[#allocation2 + $0x1e8] sm:$0xff]   ;;  %v1131_v51 = vld [vmem:[#allocation2 + $0x1e0] sm:$0xff]   ;;  %v1189_v13 = vmov 0.0  }
  0x1c   :  { %967 = vmatpush3.bf16.msra.mxu0 %v1096_v14  ;;  %618 = vmatprep.mubr.bf16.mxu0 %v880_v35  ;;  %v1124_v44 = vld [vmem:[#allocation2 + $0x130] sm:$0xff]   ;;  %v1128_v48 = vld [vmem:[#allocation2 + $0x128] sm:$0xff]   ;;  %v1132_v52 = vld [vmem:[#allocation2 + $0x120] sm:$0xff]  }
  0x1d   :  { %989 = vmatpush3.bf16.msra.mxu1 %v1097_v15  ;;  %968 = vmatprep.subr.bf16.mxu0 %v1098_v16  ;;  %v1125_v45 = vld [vmem:[#allocation2 + $0x1b0] sm:$0xff]   ;;  %v1129_v49 = vld [vmem:[#allocation2 + $0x1a8] sm:$0xff]   ;;  %v1133_v53 = vld [vmem:[#allocation2 + $0x1a0] sm:$0xff]  }
  0x1e   :  { %990 = vmatprep.subr.bf16.mxu1 %v1099_v17  ;;  %658 = vmatprep.mubr.bf16.mxu1 %v882_v37  ;;  %v1134_v54 = vld [vmem:[#allocation2 + $0x158] sm:$0xff]   ;;  %v1138_v58 = vld [vmem:[#allocation2 + $0x150] sm:$0xff]   ;;  %v1142_v62 = vld [vmem:[#allocation2 + $0x148] sm:$0xff]  }
  0x1f   :  { %v1135_v55 = vld [vmem:[#allocation2 + $0x1d8] sm:$0xff]   ;;  %v1139_v59 = vld [vmem:[#allocation2 + $0x1d0] sm:$0xff]   ;;  %v1143_v63 = vld [vmem:[#allocation2 + $0x1c8] sm:$0xff]  }
  0x20   :  { %969 = vmatpush3.bf16.msra.mxu0 %v1100_v18  ;;  %v1136_v56 = vld [vmem:[#allocation2 + $0x118] sm:$0xff]   ;;  %v1140_v60 = vld [vmem:[#allocation2 + $0x110] sm:$0xff]   ;;  %v1144_v0 = vld [vmem:[#allocation2 + $0x108] sm:$0xff]  }
  0x21   :  { %991 = vmatpush3.bf16.msra.mxu1 %v1101_v19  ;;  %970 = vmatprep.subr.bf16.mxu0 %v1102_v20  ;;  %v1137_v57 = vld [vmem:[#allocation2 + $0x198] sm:$0xff]   ;;  %v1141_v61 = vld [vmem:[#allocation2 + $0x190] sm:$0xff]   ;;  %v1145_v1 = vld [vmem:[#allocation2 + $0x188] sm:$0xff]  }
  0x22   :  { %992 = vmatprep.subr.bf16.mxu1 %v1103_v21  ;;  %v1146_v2 = vld [vmem:[#allocation2 + $0x140] sm:$0xff]   ;;  %v37_v6 = vld [vmem:[%s1269_s0 + $0x10] sm:$0xff]  ;;  %v38_v9 = vld [vmem:[%s1269_s0 + $0x18] sm:$0xff] }
  0x23   :  { %v1147_v3 = vld [vmem:[#allocation2 + $0x1c0] sm:$0xff]   ;;  %v883_v7 = vcombine.low %v37_v6, %v37_v6  ;;  %v884_v8 = vcombine.high %v37_v6, %v37_v6  ;;  %v885_v10 = vcombine.low %v38_v9, %v38_v9  ;;  %v886_v11 = vcombine.high %v38_v9, %v38_v9  ;;  %v1154_v12 = vld [vmem:[%s1272_s3 + $0x38] sm:$0xff]  }
  0x24   :  { %971 = vmatpush3.bf16.msra.mxu0 %v1104_v22  ;;  %v1148_v4 = vld [vmem:[#allocation2 + $0x100] sm:$0xff]  }
  0x25   :  { %993 = vmatpush3.bf16.msra.mxu1 %v1105_v23  ;;  %972 = vmatprep.subr.bf16.mxu0 %v1106_v24  ;;  %v1149_v5 = vld [vmem:[#allocation2 + $0x180] sm:$0xff]  }
  0x26   :  { %994 = vmatprep.subr.bf16.mxu1 %v1107_v25  ;;  %v878_v23 = vld [vmem:[%s1271_s2] ss:$0 sm:$0xff] }
  0x28   :  { %973 = vmatpush3.bf16.msra.mxu0 %v1108_v26 }
  0x29   :  { %995 = vmatpush3.bf16.msra.mxu1 %v1109_v27  ;;  %974 = vmatprep.subr.bf16.mxu0 %v1110_v28 }
  0x2a   :  { %996 = vmatprep.subr.bf16.mxu1 %v1111_v29 }
  0x2c   :  { %975 = vmatpush3.bf16.msra.mxu0 %v1112_v30 }
  0x2d   :  { %997 = vmatpush3.bf16.msra.mxu1 %v1113_v31  ;;  %1004 = vmatprep.subr.bf16.mxu0 %v1118_v38 }
  0x2e   :  { %1026 = vmatprep.subr.bf16.mxu1 %v1119_v39 }
  0x2f   :  { %619 = vmatmul.mubr.bf16.vlgmr.msra.gmra.mxu0 %v879_v34 }
  0x30   :  { %659 = vmatmul.mubr.bf16.vlgmr.msra.gmra.mxu1 %v881_v36  ;;  %1005 = vmatpush3.bf16.msra.mxu0 %v1120_v40 }
  0x31   :  { %1027 = vmatpush3.bf16.msra.mxu1 %v1121_v41  ;;  %1006 = vmatprep.subr.bf16.mxu0 %v1122_v42  ;;  %v1155_v41 = vld [vmem:[%s1272_s3 + $0x30] sm:$0xff]   ;;  %v1156_v42 = vld [vmem:[%s1272_s3 + $0x28] sm:$0xff]  }
  0x32   :  { %1028 = vmatprep.subr.bf16.mxu1 %v1123_v43  ;;  %698 = vmatprep.mubr.bf16.mxu0 %v884_v8  ;;  %v1157_v43 = vld [vmem:[%s1272_s3 + $0x20] sm:$0xff]  }
  0x33   :  { %738 = vmatprep.mubr.bf16.mxu1 %v886_v11 }
  0x34   :  { %1007 = vmatpush3.bf16.msra.mxu0 %v1124_v44  ;;  %v1158_v44 = vld [vmem:[%s1272_s3 + $0x18] sm:$0xff]  }
  0x35   :  { %1029 = vmatpush3.bf16.msra.mxu1 %v1125_v45  ;;  %1008 = vmatprep.subr.bf16.mxu0 %v1126_v46  ;;  %v1159_v45 = vld [vmem:[%s1272_s3 + $0x10] sm:$0xff]   ;;  %v1160_v46 = vld [vmem:[%s1272_s3 + $0x8] sm:$0xff]  }
  0x36   :  { %1030 = vmatprep.subr.bf16.mxu1 %v1127_v47  ;;  %v1161_v47 = vld [vmem:[%s1272_s3] sm:$0xff]  }
  0x38   :  { %1009 = vmatpush3.bf16.msra.mxu0 %v1128_v48 }
  0x39   :  { %1031 = vmatpush3.bf16.msra.mxu1 %v1129_v49  ;;  %1010 = vmatprep.subr.bf16.mxu0 %v1130_v50 }
  0x3a   :  { %1032 = vmatprep.subr.bf16.mxu1 %v1131_v51 }
  0x3c   :  { %1011 = vmatpush3.bf16.msra.mxu0 %v1132_v52 }
  0x3d   :  { %1033 = vmatpush3.bf16.msra.mxu1 %v1133_v53  ;;  %1012 = vmatprep.subr.bf16.mxu0 %v1134_v54 }
  0x3e   :  { %1034 = vmatprep.subr.bf16.mxu1 %v1135_v55 }
  0x40   :  { %1013 = vmatpush3.bf16.msra.mxu0 %v1136_v56 }
  0x41   :  { %1035 = vmatpush3.bf16.msra.mxu1 %v1137_v57  ;;  %1014 = vmatprep.subr.bf16.mxu0 %v1138_v58 }
  0x42   :  { %1036 = vmatprep.subr.bf16.mxu1 %v1139_v59  ;;  %v951_v59 = vld [vmem:[%s1273_s4] ss:$0 sm:$0xff] }
  0x44   :  { %1015 = vmatpush3.bf16.msra.mxu0 %v1140_v60 }
  0x45   :  { %1037 = vmatpush3.bf16.msra.mxu1 %v1141_v61  ;;  %1016 = vmatprep.subr.bf16.mxu0 %v1142_v62 }
  0x46   :  { %1038 = vmatprep.subr.bf16.mxu1 %v1143_v63 }
  0x48   :  { %1017 = vmatpush3.bf16.msra.mxu0 %v1144_v0 }
  0x49   :  { %1039 = vmatpush3.bf16.msra.mxu1 %v1145_v1  ;;  %1018 = vmatprep.subr.bf16.mxu0 %v1146_v2 }
  0x4a   :  { %1040 = vmatprep.subr.bf16.mxu1 %v1147_v3 }
  0x4c   :  { %1019 = vmatpush3.bf16.msra.mxu0 %v1148_v4 }
  0x4d   :  { %1041 = vmatpush3.bf16.msra.mxu1 %v1149_v5  ;;  %1057 = vmatprep.subr.bf16.mxu0 %v1189_v13 }
  0x4f   :  { %699 = vmatmul.mubr.bf16.vlgmr.msra.gmra.mxu0 %v883_v7 }
  0x50   :  { %739 = vmatmul.mubr.bf16.vlgmr.msra.gmra.mxu1 %v885_v10  ;;  %1058 = vmatpush3.bf16.msra.mxu0 %v1154_v12 }
  0x51   :  { %1059 = vmatprep.subr.bf16.mxu0 %v1189_v13  ;;  %1073 = vmatprep.mubr.msk.bf16.mxu0 %vm1190_vm0, %v1189_v13 }
  0x54   :  { %1060 = vmatpush3.bf16.msra.mxu0 %v1155_v41 }
  0x55   :  { %1061 = vmatprep.subr.bf16.mxu0 %v1189_v13 }
  0x58   :  { %1062 = vmatpush3.bf16.msra.mxu0 %v1156_v42 }
  0x59   :  { %1063 = vmatprep.subr.bf16.mxu0 %v1189_v13 }
  0x5c   :  { %1064 = vmatpush3.bf16.msra.mxu0 %v1157_v43 }
  0x5d   :  { %1065 = vmatprep.subr.bf16.mxu0 %v1189_v13 }
  0x60   :  { %1066 = vmatpush3.bf16.msra.mxu0 %v1158_v44 }
  0x61   :  { %1067 = vmatprep.subr.bf16.mxu0 %v1189_v13 }
  0x64   :  { %1068 = vmatpush3.bf16.msra.mxu0 %v1159_v45 }
  0x65   :  { %1069 = vmatprep.subr.bf16.mxu0 %v1189_v13 }
  0x68   :  { %1070 = vmatpush3.bf16.msra.mxu0 %v1160_v46 }
  0x69   :  { %1071 = vmatprep.subr.bf16.mxu0 %v1189_v13 }
  0x6c   :  { %1072 = vmatpush3.bf16.msra.mxu0 %v1161_v47 }
  0xef   :  { %v976_v14 = vpop.f32.mrf.mxu0 }
  0xf0   :  { %v998_v15 = vpop.f32.mrf.mxu1 }
  0xf1   :  { %v977_v16 = vpop.f32.mrf.mxu0 }
  0xf2   :  { %v999_v17 = vpop.f32.mrf.mxu1  ;;  %v978_v22 = vadd.f32 %v977_v16, %v976_v14 }
  0xf3   :  { %v979_v18 = vpop.f32.mrf.mxu0  ;;  %v1000_v25 = vadd.f32 %v999_v17, %v998_v15 }
  0xf4   :  { %v1001_v19 = vpop.f32.mrf.mxu1  ;;  %v621_v24 = vadd.f32 %v978_v22, %v878_v23 }
  0xf5   :  { %v980_v20 = vpop.f32.mrf.mxu0 }
  0xf6   :  { %v1002_v21 = vpop.f32.mrf.mxu1  ;;  %v661_v30 = vadd.f32 %v1000_v25, %v621_v24 }
 0x10f   :  { %v1020_v26 = vpop.f32.mrf.mxu0 }
 0x110   :  { %v1042_v27 = vpop.f32.mrf.mxu1 }
 0x111   :  { %v1021_v28 = vpop.f32.mrf.mxu0 }
 0x112   :  { %v1043_v29 = vpop.f32.mrf.mxu1  ;;  %v1022_v31 = vadd.f32 %v1021_v28, %v1020_v26 }
 0x113   :  { %v1023_v32 = vpop.f32.mrf.mxu0  ;;  %v1044_v35 = vadd.f32 %v1043_v29, %v1042_v27 }
 0x114   :  { %v1045_v33 = vpop.f32.mrf.mxu1  ;;  %v701_v34 = vadd.f32 %v1022_v31, %v661_v30 }
 0x115   :  { %v1024_v36 = vpop.f32.mrf.mxu0 }
 0x116   :  { %v1046_v37 = vpop.f32.mrf.mxu1  ;;  %v741_v38 = vadd.f32 %v1044_v35, %v701_v34 }
 0x118   :  { %v746_v39 = vmax.f32 %v741_v38, 0.0 }
 0x11a   :  { %747 = vadd.xlane.f32.xlu0 %v746_v39  ;;  %v750_v40 = vmul.f32 %v746_v39, %v746_v39 }
 0x11e   :  { %751 = vadd.xlane.f32.xlu0 %v750_v40 }
 0x1a3   :  { %v748_v48 = vpop.xlane.xlu0 %747 }
 0x1a4   :  { %v749_v49 = vmul.f32 0.03125, %v748_v48 }
 0x1a6   :  { %v754_v51 = vmul.f32 %v749_v49, %v749_v49  ;;  %v756_v55 = vsub.f32 %v746_v39, %v749_v49 }
 0x1a7   :  { %v752_v50 = vpop.xlane.xlu0 %751 }
 0x1a8   :  { %v753_v52 = vmul.f32 0.03125, %v752_v50 }
 0x1aa   :  { %v755_v53 = vsub.f32 %v753_v52, %v754_v51 }
 0x1ac   :  { %v757_v54 = vadd.f32 1e-05, %v755_v53 }
 0x1ae   :  { %1162 = vrsqrt.f32 %v757_v54 }
 0x1bb   :  { %v1163_v56 = vpop.eup %1162 }
 0x1bc   :  { %v759_v57 = vmul.f32 %v1163_v56, %v756_v55 }
 0x1be   :  { %v760_v58 = vpack.c.bf16 %v759_v57, %v759_v57 }
 0x1c0   :  { %1074 = vmatmul.mubr.bf16.vlgmr.msra.gmra.mxu0 %v760_v58 }
 0x280   :  { %v866_v60 = vpop.f32.mrf.mxu0 }
 0x281   :  { %v867_v61 = vadd.f32 %v951_v59, %v866_v60 }
 0x282   :  { %v1075_v62 = vpop.f32.mrf.mxu0 }
 0x283   :  { %872 = vst [vmem:[%s1274_s5] sm:$0xff] %v867_v61 }
 0x284   :  { %v869_v63 = vpop.f32.mrf.mxu0 }
 0x286   :  { %v1076_v0 = vpop.f32.mrf.mxu0 }
 0x287   :  { %877 = vsyncpa [#allocation3], 1 }

</bundles_post_ra>
